<compile_context>
chip_gen: v5e
topology: v5e:2x2
jax: 0.10.0
libtpu: 0.0.40
codegen_flags: <defaults>
</compile_context>

<pallas_src>
import functools

import numpy as np
import jax
import jax.numpy as jnp
from jax.experimental import pallas as pl
from jax.experimental.pallas import tpu as pltpu


# ----------------------------- small helpers -----------------------------

def _round_up(x, m):
    return ((x + m - 1) // m) * m


def _pick_tile(dim, preferred, align=8):
    """Largest divisor of `dim` <= preferred that is a multiple of `align`;
    falls back to the full dim (allowed by the full-extent BlockSpec rule)."""
    if dim <= preferred:
        return dim
    t = (preferred // align) * align
    while t >= align:
        if dim % t == 0:
            return t
        t -= align
    return dim


def _mosaic_params(semantics, working_set_bytes):
    """dimension_semantics + an explicit scoped-VMEM limit sized to the block
    working set (floor = 32 MiB which is safe on v5e/v6e/v7x, cap = 64 MiB)."""
    limit = int(min(max(2 * working_set_bytes + (8 << 20), 32 << 20), 64 << 20))
    return pltpu.CompilerParams(dimension_semantics=semantics,
                                vmem_limit_bytes=limit)


def _erf(x):
    # Abramowitz & Stegun 7.1.26 polynomial (|err| < 1.5e-7): matches exact-erf
    # GELU (nn.GELU default) at bf16/f32 precision using only VPU/EUP ops.
    a1, a2, a3, a4, a5 = 0.254829592, -0.284496736, 1.421413741, -1.453152027, 1.061405429
    p = 0.3275911
    sgn = jnp.where(x >= 0.0, 1.0, -1.0)
    ax = jnp.abs(x)
    t = 1.0 / (1.0 + p * ax)
    poly = ((((a5 * t + a4) * t + a3) * t + a2) * t + a1) * t
    return sgn * (1.0 - poly * jnp.exp(-ax * ax))


# ----------------------------- fused linear kernel -----------------------------

def _fused_linear_kernel(*refs, has_ln, has_bias, has_res, gelu, eps):
    """out = [GELU]([LayerNorm](x) @ W [+ b]) [+ residual]  on one (tm, N) tile.
    Full K and full N per tile, so LN is computed exactly once per row tile."""
    it = iter(refs)
    x_ref = next(it)
    if has_ln:
        g_ref = next(it)
        beta_ref = next(it)
    w_ref = next(it)
    b_ref = next(it) if has_bias else None
    r_ref = next(it) if has_res else None
    o_ref = next(it)

    x = x_ref[...]
    if has_ln:
        xf = x.astype(jnp.float32)
        mean = jnp.mean(xf, axis=-1, keepdims=True)
        xc = xf - mean
        var = jnp.mean(xc * xc, axis=-1, keepdims=True)
        x = (xc * jax.lax.rsqrt(var + eps) * g_ref[...]
             + beta_ref[...]).astype(w_ref.dtype)

    y = jnp.dot(x, w_ref[...], preferred_element_type=jnp.float32)
    if has_bias:
        y = y + b_ref[...]
    if gelu:
        y = 0.5 * y * (1.0 + _erf(y * 0.7071067811865476))
    if has_res:
        y = y + r_ref[...].astype(jnp.float32)
    o_ref[...] = y.astype(o_ref.dtype)


def pallas_fused_linear(x, w, *, bias=None, ln=None, residual=None, gelu=False,
                        eps=1e-5, tm=512, out_dtype=jnp.bfloat16):
    """x: (M, K) bf16, w: (K, N) bf16, bias: (N,) f32, ln: (gamma, beta) f32,
    residual: (M, N) bf16 -> (M, N) out_dtype."""
    M, K = x.shape
    N = w.shape[1]
    tm = _pick_tile(M, tm, 8)
    has_ln = ln is not None
    has_bias = bias is not None
    has_res = residual is not None

    inputs = [x]
    in_specs = [pl.BlockSpec((tm, K), lambda i: (i, 0))]
    if has_ln:
        gamma, beta = ln
        inputs += [gamma.reshape(1, K).astype(jnp.float32),
                   beta.reshape(1, K).astype(jnp.float32)]
        in_specs += [pl.BlockSpec((1, K), lambda i: (0, 0)),
                     pl.BlockSpec((1, K), lambda i: (0, 0))]
    inputs.append(w)
    in_specs.append(pl.BlockSpec((K, N), lambda i: (0, 0)))  # constant block idx
    if has_bias:
        inputs.append(bias.reshape(1, N).astype(jnp.float32))
        in_specs.append(pl.BlockSpec((1, N), lambda i: (0, 0)))
    if has_res:
        inputs.append(residual)
        in_specs.append(pl.BlockSpec((tm, N), lambda i: (i, 0)))

    ws = (tm * K + K * N + tm * N * (2 if has_res else 1)) * 2 + tm * N * 4
    kernel = functools.partial(_fused_linear_kernel, has_ln=has_ln,
                               has_bias=has_bias, has_res=has_res,
                               gelu=gelu, eps=eps)
    return pl.pallas_call(
        kernel,
        out_shape=jax.ShapeDtypeStruct((M, N), out_dtype),
        grid=(M // tm,),
        in_specs=in_specs,
        out_specs=pl.BlockSpec((tm, N), lambda i: (i, 0)),
        compiler_params=_mosaic_params(("parallel",), ws),
    )(*inputs)


# ----------------------------- attention kernel -----------------------------

def _attention_kernel(qkv_ref, o_ref, *, scale, nv_valid):
    """One (batch, head) pair. qkv_ref: (3, 1, Nv, Dh) bf16 -> o_ref: (1, Nv, Dh)."""
    q = qkv_ref[0, 0] * scale            # fold softmax scale into q (Nv*Dh muls)
    k = qkv_ref[1, 0]
    v = qkv_ref[2, 0]
    # s[n, m] = sum_d q[n, d] * k[m, d]  (lane axis stays Nv)
    s = jax.lax.dot_general(q, k, (((1,), (1,)), ((), ())),
                            preferred_element_type=jnp.float32)
    if nv_valid != q.shape[0]:           # mask padded key columns
        col = jax.lax.broadcasted_iota(jnp.int32, s.shape, 1)
        s = jnp.where(col < nv_valid, s, -1e30)
    s = s - jnp.max(s, axis=-1, keepdims=True)
    p = jnp.exp(s)
    # approx reciprocal on the EUP; ~1e-3 rel. error, fine for a bf16 policy.
    p = p * pl.reciprocal(jnp.sum(p, axis=-1, keepdims=True), approx=True)
    o_ref[0] = jnp.dot(p.astype(v.dtype), v,
                       preferred_element_type=jnp.float32).astype(o_ref.dtype)
    # TODO(synk): for fine-tune sequence lengths (Nv ~ 1568) tile Nv with an
    # online-softmax (flash) accumulator so the (Nv, Nv) scores fit v7x's 64 MiB.


def pallas_attention(qkv, B, Nv, nh, Dh, scale, nv_valid):
    """qkv: (B*Nv, 3*nh*Dh) bf16 -> (B*Nv, nh*Dh) bf16."""
    D = nh * Dh
    # One XLA transpose to hand the kernel lane-aligned per-head operands.
    q3 = qkv.reshape(B, Nv, 3, nh, Dh).transpose(2, 0, 3, 1, 4)
    q3 = q3.reshape(3, B * nh, Nv, Dh)
    ws = 4 * Nv * Dh * 2 + 2 * Nv * Nv * 4
    out = pl.pallas_call(
        functools.partial(_attention_kernel, scale=scale, nv_valid=nv_valid),
        out_shape=jax.ShapeDtypeStruct((B * nh, Nv, Dh), qkv.dtype),
        grid=(B * nh,),
        in_specs=[pl.BlockSpec((3, 1, Nv, Dh), lambda g: (0, g, 0, 0))],
        out_specs=pl.BlockSpec((1, Nv, Dh), lambda g: (g, 0, 0)),
        compiler_params=_mosaic_params(("parallel",), ws),
    )(q3)
    return out.reshape(B, nh, Nv, Dh).transpose(0, 2, 1, 3).reshape(B * Nv, D)


# ----------------------------- final LayerNorm -----------------------------

def _layernorm_kernel(x_ref, w_ref, b_ref, o_ref, *, eps):
    x = x_ref[...].astype(jnp.float32)
    mean = jnp.mean(x, axis=-1, keepdims=True)
    xc = x - mean
    var = jnp.mean(xc * xc, axis=-1, keepdims=True)
    o_ref[...] = (xc * jax.lax.rsqrt(var + eps) * w_ref[...]
                  + b_ref[...]).astype(o_ref.dtype)


def pallas_layernorm(x, w, b, *, eps=1e-5, tm=512, out_dtype=jnp.float32):
    M, C = x.shape
    tm = _pick_tile(M, tm, 8)
    ws = 3 * tm * C * 4
    return pl.pallas_call(
        functools.partial(_layernorm_kernel, eps=eps),
        out_shape=jax.ShapeDtypeStruct((M, C), out_dtype),
        grid=(M // tm,),
        in_specs=[pl.BlockSpec((tm, C), lambda i: (i, 0)),
                  pl.BlockSpec((1, C), lambda i: (0, 0)),
                  pl.BlockSpec((1, C), lambda i: (0, 0))],
        out_specs=pl.BlockSpec((tm, C), lambda i: (i, 0)),
        compiler_params=_mosaic_params(("parallel",), ws),
    )(x, w.reshape(1, C), b.reshape(1, C))


# ----------------------------- model glue -----------------------------

def get_sinusoid_encoding_table(n_position, d_hid):
    pos = np.arange(n_position, dtype=np.float64)[:, None]
    hid = np.arange(d_hid, dtype=np.float64)[None, :]
    angle = pos / np.power(10000.0, 2.0 * np.floor(hid / 2.0) / d_hid)
    table = np.zeros_like(angle)
    table[:, 0::2] = np.sin(angle[:, 0::2])
    table[:, 1::2] = np.cos(angle[:, 1::2])
    return jnp.asarray(table[None], dtype=jnp.float32)  # (1, n_position, d_hid)


def init_params(key, *, in_chans, embed_dim, depth, mlp_ratio,
                tubelet_size, patch_size):
    """Synthetic init matching the module's _init_weights scheme.  Matmul
    weights are bf16 (MXU-native); biases/LayerNorm params stay f32."""
    kpatch = in_chans * tubelet_size * patch_size * patch_size
    hidden = int(embed_dim * mlp_ratio)

    def tn(k, shape):
        return (0.02 * jax.random.truncated_normal(k, -2.0, 2.0, shape)
                ).astype(jnp.bfloat16)

    keys = jax.random.split(key, depth + 1)
    params = {
        "patch_w": tn(keys[0], (kpatch, embed_dim)),          # Conv3d as matmul
        "patch_b": jnp.zeros((embed_dim,), jnp.float32),
        "norm_w": jnp.ones((embed_dim,), jnp.float32),
        "norm_b": jnp.zeros((embed_dim,), jnp.float32),
        "blocks": [],
    }
    for i in range(depth):
        ks = jax.random.split(keys[i + 1], 4)
        params["blocks"].append(dict(
            ln1_w=jnp.ones((embed_dim,), jnp.float32),
            ln1_b=jnp.zeros((embed_dim,), jnp.float32),
            qkv_w=tn(ks[0], (embed_dim, 3 * embed_dim)),       # qkv_bias=False
            proj_w=tn(ks[1], (embed_dim, embed_dim)),
            proj_b=jnp.zeros((embed_dim,), jnp.float32),
            ln2_w=jnp.ones((embed_dim,), jnp.float32),
            ln2_b=jnp.zeros((embed_dim,), jnp.float32),
            fc1_w=tn(ks[2], (embed_dim, hidden)),
            fc1_b=jnp.zeros((hidden,), jnp.float32),
            fc2_w=tn(ks[3], (hidden, embed_dim)),
            fc2_b=jnp.zeros((embed_dim,), jnp.float32),
        ))
    return params


def videomae_encoder_forward(params, x, vis_idx, cfg):
    """x: (B, C, T, H, W) float32; vis_idx: (B, N_vis) indices of un-masked
    patches (precomputed from the boolean `mask`, equal count per sample, as
    required by x[~mask].reshape(B, -1, C))."""
    B, C, T, H, W = x.shape
    ts, ps = cfg["tubelet_size"], cfg["patch_size"]
    D = cfg["embed_dim"]
    nh = cfg["num_heads"]
    Dh = D // nh
    scale = Dh ** -0.5
    Tn, Hn, Wn = T // ts, H // ps, W // ps
    num_patches = Tn * Hn * Wn
    Nv = vis_idx.shape[1]
    Kp = C * ts * ps * ps

    # Pad the per-sample visible-token count so every row-tiled kernel sees an
    # aligned M (and the attention score matrix stays aligned); padded rows are
    # key-masked in attention and sliced off at the end.
    nv_align = 128 if Nv >= 128 else 8
    Nv_pad = _round_up(Nv, nv_align)
    Mp = B * Nv_pad

    # bf16 BEFORE im2col: halves the largest HBM pass in the model.
    # im2col of Conv3d(kernel == stride); token order (t, h, w) matches
    # Conv3d -> flatten(2) -> transpose(1, 2).
    xb = x.astype(jnp.bfloat16)
    xr = xb.reshape(B, C, Tn, ts, Hn, ps, Wn, ps)
    xr = xr.transpose(0, 2, 4, 6, 1, 3, 5, 7).reshape(B, num_patches, Kp)

    # Gather visible patches BEFORE the projection (Conv3d is a per-patch linear
    # map, so gather->conv->+pos(gathered) == conv->+pos->gather).
    # TODO(synk): fold this gather into the patch-embed kernel via
    # PrefetchScalarGridSpec(num_scalar_prefetch=1) + a manual row-gather DMA.
    bidx = jnp.arange(B)[:, None]
    xr_vis = xr[bidx, vis_idx]                                       # (B, Nv, Kp) bf16
    pos_vis = params["pos_embed"][0][vis_idx].astype(jnp.bfloat16)   # (B, Nv, D)
    if Nv_pad != Nv:
        pad = ((0, 0), (0, Nv_pad - Nv), (0, 0))
        xr_vis = jnp.pad(xr_vis, pad)
        pos_vis = jnp.pad(pos_vis, pad)
    xr_vis = xr_vis.reshape(Mp, Kp)
    pos_vis = pos_vis.reshape(Mp, D)

    # PatchEmbed matmul + bias, fused with the positional-embedding add.
    xc = pallas_fused_linear(xr_vis, params["patch_w"],
                             bias=params["patch_b"], residual=pos_vis)

    # pos_drop / attn_drop / drop_path are identity (all drop rates are 0);
    # init_values=0.0 -> no layer-scale gammas; cos_attn=False.
    for blk in params["blocks"]:
        # --- Attention branch: fused LN1 + qkv (no bias), per-(batch, head)
        #     attention, fused proj + bias + residual.
        qkv = pallas_fused_linear(xc, blk["qkv_w"],
                                  ln=(blk["ln1_w"], blk["ln1_b"]))
        attn = pallas_attention(qkv, B, Nv_pad, nh, Dh, scale, Nv)
        xc = pallas_fused_linear(attn, blk["proj_w"],
                                 bias=blk["proj_b"], residual=xc)

        # --- MLP branch: fused LN2 + fc1 + exact GELU, fused fc2 + bias + residual.
        h = pallas_fused_linear(xc, blk["fc1_w"], bias=blk["fc1_b"],
                                ln=(blk["ln2_w"], blk["ln2_b"]), gelu=True)
        xc = pallas_fused_linear(h, blk["fc2_w"], bias=blk["fc2_b"], residual=xc)

    out = pallas_layernorm(xc, params["norm_w"], params["norm_b"])
    return out.reshape(B, Nv_pad, D)[:, :Nv]


# ----------------------------- main -----------------------------

if __name__ == "__main__":
    cfg = dict(num_frames=4, img_size=16, patch_size=8, in_chans=3,
               embed_dim=32, depth=2, num_heads=4, mlp_ratio=4.0,
               tubelet_size=2)
    B = 2
    num_patches = ((cfg["num_frames"] // cfg["tubelet_size"])
                   * (cfg["img_size"] // cfg["patch_size"]) ** 2)   # = 8

    key = jax.random.PRNGKey(0)
    kx, kp = jax.random.split(key)
    x = jax.random.normal(
        kx, (B, cfg["in_chans"], cfg["num_frames"], cfg["img_size"], cfg["img_size"]),
        dtype=jnp.float32)

    # Deterministic boolean mask (True = masked), 50% ratio, equal per sample.
    mask_np = np.zeros((B, num_patches), dtype=bool)
    mask_np[:, 0::2] = True
    vis_idx = jnp.asarray(
        np.stack([np.nonzero(~mask_np[b])[0] for b in range(B)]), dtype=jnp.int32)

    params = init_params(kp,
                         in_chans=cfg["in_chans"], embed_dim=cfg["embed_dim"],
                         depth=cfg["depth"], mlp_ratio=cfg["mlp_ratio"],
                         tubelet_size=cfg["tubelet_size"], patch_size=cfg["patch_size"])
    params["pos_embed"] = get_sinusoid_encoding_table(num_patches, cfg["embed_dim"])

    out = videomae_encoder_forward(params, x, vis_idx, cfg)
    out = jax.block_until_ready(out)
    assert out.shape == (B, num_patches // 2, cfg["embed_dim"])
    assert bool(jnp.all(jnp.isfinite(out)))
    print("KERNEL_OK")
</pallas_src>

<mosaic_0001>
module attributes {stable_mosaic.version = 11 : i64} {
  func.func @_fused_linear_kernel(%arg0: i32, %arg1: memref<16x384xbf16, #tpu.memory_space<vmem>>, %arg2: memref<384x32xbf16, #tpu.memory_space<vmem>>, %arg3: memref<1x32xf32, #tpu.memory_space<vmem>>, %arg4: memref<16x32xbf16, #tpu.memory_space<vmem>>, %arg5: memref<16x32xbf16, #tpu.memory_space<vmem>>) attributes {dimension_semantics = [#tpu.dimension_semantics<parallel>], iteration_bounds = array<i64: 1>, scalar_prefetch = 0 : i64, scratch_operands = 0 : i64, tpu.core_type = #tpu.core_type<tc>, window_params = [{transform_indices = @transform_0, window_bounds = array<i64: 16, 384>}, {pipeline_mode = #tpu.pipeline_mode<synchronous>, transform_indices = @transform_1, window_bounds = array<i64: 384, 32>}, {pipeline_mode = #tpu.pipeline_mode<synchronous>, transform_indices = @transform_2, window_bounds = array<i64: 1, 32>}, {transform_indices = @transform_3, window_bounds = array<i64: 16, 32>}, {transform_indices = @transform_4, window_bounds = array<i64: 16, 32>}]} {
    %c0 = arith.constant 0 : index
    %c0_0 = arith.constant 0 : index
    %0 = vector.load %arg1[%c0, %c0_0] : memref<16x384xbf16, #tpu.memory_space<vmem>>, vector<16x384xbf16>
    %c0_1 = arith.constant 0 : index
    %c0_2 = arith.constant 0 : index
    %1 = vector.load %arg2[%c0_1, %c0_2] : memref<384x32xbf16, #tpu.memory_space<vmem>>, vector<384x32xbf16>
    %cst = arith.constant dense<0.000000e+00> : vector<16x32xf32>
    %2 = tpu.matmul %0, %1, %cst {dimension_numbers = #tpu.dot_dimension_numbers<[1], [0], [0], [1], [0, 0, 1, 1], [], []>} : vector<16x384xbf16>, vector<384x32xbf16>, vector<16x32xf32> -> vector<16x32xf32>
    %c0_3 = arith.constant 0 : index
    %c0_4 = arith.constant 0 : index
    %3 = vector.load %arg3[%c0_3, %c0_4] : memref<1x32xf32, #tpu.memory_space<vmem>>, vector<1x32xf32>
    %4 = vector.broadcast %3 : vector<1x32xf32> to vector<16x32xf32>
    %5 = arith.addf %2, %4 : vector<16x32xf32>
    %c0_5 = arith.constant 0 : index
    %c0_6 = arith.constant 0 : index
    %6 = vector.load %arg4[%c0_5, %c0_6] : memref<16x32xbf16, #tpu.memory_space<vmem>>, vector<16x32xbf16>
    %7 = arith.extf %6 : vector<16x32xbf16> to vector<16x32xf32>
    %8 = arith.addf %5, %7 : vector<16x32xf32>
    %9 = arith.truncf %8 : vector<16x32xf32> to vector<16x32xbf16>
    %c0_7 = arith.constant 0 : index
    %c0_8 = arith.constant 0 : index
    %10 = vector.load %arg5[%c0_7, %c0_8] : memref<16x32xbf16, #tpu.memory_space<vmem>>, vector<16x32xbf16>
    tpu.vector_store %arg5[%c0_7, %c0_8], %9 {strides = array<i32>} : memref<16x32xbf16, #tpu.memory_space<vmem>>, vector<16x32xbf16>,
    return
  }
  func.func @transform_0(%arg0: i32) -> (i32, i32) {
    %c0_i32 = arith.constant 0 : i32
    %c0_i32_0 = arith.constant 0 : i32
    return %arg0, %c0_i32 : i32, i32
  }
  func.func @transform_1(%arg0: i32) -> (i32, i32) {
    %c0_i32 = arith.constant 0 : i32
    %c0_i32_0 = arith.constant 0 : i32
    %c0_i32_1 = arith.constant 0 : i32
    return %c0_i32, %c0_i32_0 : i32, i32
  }
  func.func @transform_2(%arg0: i32) -> (i32, i32) {
    %c0_i32 = arith.constant 0 : i32
    %c0_i32_0 = arith.constant 0 : i32
    %c0_i32_1 = arith.constant 0 : i32
    return %c0_i32, %c0_i32_0 : i32, i32
  }
  func.func @transform_3(%arg0: i32) -> (i32, i32) {
    %c0_i32 = arith.constant 0 : i32
    %c0_i32_0 = arith.constant 0 : i32
    return %arg0, %c0_i32 : i32, i32
  }
  func.func @transform_4(%arg0: i32) -> (i32, i32) {
    %c0_i32 = arith.constant 0 : i32
    %c0_i32_0 = arith.constant 0 : i32
    return %arg0, %c0_i32 : i32, i32
  }
}

</mosaic_0001>

<bundles_post_ra>
// kernel: tpu_custom_call.1
= control target key start
LH: loop header
LB: loop body
LE: loop exit
PB: predicated region body
PF: predicated region fallthrough
CT: control target
= control target key end

     0   :  { %s601_s0 = inlined_call_operand.vmem [shape: bf16[16,384], index: 0, kind: input, shape index: {}]   ;;  %s602_s1 = inlined_call_operand.vmem [shape: bf16[384,32], index: 1, kind: input, shape index: {}]   ;;  %s603_s2 = inlined_call_operand.vmem [shape: f32[1,32], index: 2, kind: input, shape index: {}]   ;;  %s604_s3 = inlined_call_operand.vmem [shape: bf16[16,32], index: 3, kind: input, shape index: {}]   ;;  %s605_s4 = inlined_call_operand.hbm [shape: bf16[16,32], index: 4, kind: output, shape index: {}]  }
   0x1   :  { %v423_v0 = vld [vmem:[%s602_s1 + $0x38] sm:$0xff]  ;;  %v422_v3 = vld [vmem:[%s602_s1 + $0x30] sm:$0xff]  ;;  %v421_v6 = vld [vmem:[%s602_s1 + $0x28] sm:$0xff] }
   0x2   :  { %v431_v1 = vld [vmem:[%s602_s1 + $0x78] sm:$0xff]  ;;  %234 = vmatpush.bf16.msra.mxu0 %v423_v0  ;;  %v430_v4 = vld [vmem:[%s602_s1 + $0x70] sm:$0xff]  ;;  %v429_v7 = vld [vmem:[%s602_s1 + $0x68] sm:$0xff] }
   0x3   :  { %v439_v2 = vld [vmem:[%s602_s1 + $0xb8] sm:$0xff]  ;;  %248 = vmatpush.bf16.msra.mxu1 %v431_v1  ;;  %v438_v5 = vld [vmem:[%s602_s1 + $0xb0] sm:$0xff]  ;;  %v437_v8 = vld [vmem:[%s602_s1 + $0xa8] sm:$0xff] }
   0x4   :  { %262 = vmatpush.bf16.msra.mxu2 %v439_v2  ;;  %v420_v9 = vld [vmem:[%s602_s1 + $0x20] sm:$0xff] }
   0x5   :  { %v428_v10 = vld [vmem:[%s602_s1 + $0x60] sm:$0xff] }
   0x6   :  { %235 = vmatpush.bf16.msra.mxu0 %v422_v3 }
   0x7   :  { %249 = vmatpush.bf16.msra.mxu1 %v430_v4 }
   0x8   :  { %263 = vmatpush.bf16.msra.mxu2 %v438_v5 }
   0xa   :  { %236 = vmatpush.bf16.msra.mxu0 %v421_v6 }
   0xb   :  { %250 = vmatpush.bf16.msra.mxu1 %v429_v7 }
   0xc   :  { %9 = vsyncpa [#allocation3], 0  ;;  %264 = vmatpush.bf16.msra.mxu2 %v437_v8  ;;  %v436_v11 = vld [vmem:[%s602_s1 + $0xa0] sm:$0xff]  ;;  %v419_v12 = vld [vmem:[%s602_s1 + $0x18] sm:$0xff]  ;;  %vm284_vm0 = vcmask 257024   ;;  %s475_s28 = smov 64  }
   0xd   :  { %v427_v13 = vld [vmem:[%s602_s1 + $0x58] sm:$0xff]  ;;  %v418_v15 = vld [vmem:[%s602_s1 + $0x10] sm:$0xff]  ;;  %v417_v18 = vld [vmem:[%s602_s1 + $0x8] sm:$0xff]  ;;  %s476_s29 = smov 4  }
   0xe   :  { %237 = vmatpush.bf16.msra.mxu0 %v420_v9  ;;  %v435_v14 = vld [vmem:[%s602_s1 + $0x98] sm:$0xff]  ;;  %v426_v16 = vld [vmem:[%s602_s1 + $0x50] sm:$0xff]  ;;  %v425_v19 = vld [vmem:[%s602_s1 + $0x48] sm:$0xff] }
   0xf   :  { %251 = vmatpush.bf16.msra.mxu1 %v428_v10  ;;  %v434_v17 = vld [vmem:[%s602_s1 + $0x90] sm:$0xff]  ;;  %v433_v20 = vld [vmem:[%s602_s1 + $0x88] sm:$0xff]  ;;  %v416_v21 = vld [vmem:[%s602_s1] sm:$0xff] }
  0x10   :  { %265 = vmatpush.bf16.msra.mxu2 %v436_v11  ;;  %v424_v22 = vld [vmem:[%s602_s1 + $0x40] sm:$0xff]  ;;  %v414_v24 = vld [vmem:[%s601_s0 + $0x8] sm:$0xf0]  ;;  %v309_v26 = vld [vmem:[%s601_s0 + $0xc] sm:$0xf0] }
  0x11   :  { %v307_v23 = vld [vmem:[%s601_s0] sm:$0xf]  ;;  %v413_v25 = vld [vmem:[%s601_s0 + $0x4] sm:$0xf]  ;;  %v315_v28 = vld [vmem:[%s601_s0 + $0x8] sm:$0xf] }
  0x12   :  { %238 = vmatpush.bf16.msra.mxu0 %v419_v12  ;;  %v432_v27 = vld [vmem:[%s602_s1 + $0x80] sm:$0xff]  ;;  %v415_v29 = vld [vmem:[%s601_s0 + $0x10] sm:$0xf0]  ;;  %v308_v30 = vor.u32 %v414_v24, %v307_v23  ;;  %v312_v31 = vor.u32 %v413_v25, %v309_v26  ;;  %s474_s0 = smov [#allocation2]  }
  0x13   :  { %252 = vmatpush.bf16.msra.mxu1 %v427_v13  ;;  %v316_v32 = vor.u32 %v415_v29, %v315_v28  ;;  %v447_v33 = vld [vmem:[%s603_s2] ss:$0 sm:$0xff]  ;;  %s291_s2 = sshll.u32 %s474_s0, 4  ;;  %s292_s2 = int_to_ptr.vmem [resolvable:$true] %s291_s2 }
  0x14   :  { %266 = vmatpush.bf16.msra.mxu2 %v435_v14  ;;  %v441_v37 = vld [vmem:[%s604_s3] sm:$0xff]   ;;  %s293_s3 = sshll.u32 %s605_s4, 4  ;;  %s294_s3 = int_to_ptr.hbm [resolvable:$true] %s293_s3 }
  0x15   :  { %v442_v39 = vunpack.c.l.bf16 %v441_v37  ;;  %v443_v48 = vunpack.c.h.bf16 %v441_v37 }
  0x16   :  { %239 = vmatpush.bf16.msra.mxu0 %v418_v15 }
  0x17   :  { %253 = vmatpush.bf16.msra.mxu1 %v426_v16 }
  0x18   :  { %267 = vmatpush.bf16.msra.mxu2 %v434_v17 }
  0x1a   :  { %240 = vmatpush.bf16.msra.mxu0 %v417_v18 }
  0x1b   :  { %254 = vmatpush.bf16.msra.mxu1 %v425_v19 }
  0x1c   :  { %268 = vmatpush.bf16.msra.mxu2 %v433_v20 }
  0x1e   :  { %241 = vmatpush.bf16.msra.mxu0 %v416_v21 }
  0x1f   :  { %255 = vmatpush.bf16.msra.mxu1 %v424_v22 }
  0x20   :  { %269 = vmatpush.bf16.msra.mxu2 %v432_v27 }
  0x21   :  { %242 = vmatmul.bf16.vlgmr.msra.gmra.mxu0 %v308_v30 }
  0x22   :  { %256 = vmatmul.bf16.vlgmr.msra.gmra.mxu1 %v312_v31 }
  0x23   :  { %270 = vmatmul.bf16.vlgmr.msra.gmra.mxu2 %v316_v32 }
  0x9e   :  { %v243_v34 = vpop.f32.mrf.mxu0 }
  0x9f   :  { %v244_v35 = vadd.f32 %v447_v33, %v243_v34  ;;  %v257_v36 = vpop.f32.mrf.mxu1 }
  0xa1   :  { %v258_v38 = vadd.f32 %v257_v36, %v244_v35 }
  0xa6   :  { %v271_v40 = vpop.f32.mrf.mxu2  ;;  %v245_v42 = vpop.f32.mrf.mxu0 }
  0xa7   :  { %v272_v41 = vadd.f32 %v271_v40, %v258_v38  ;;  %v246_v44 = vadd.f32 %v447_v33, %v245_v42  ;;  %v259_v46 = vpop.f32.mrf.mxu1 }
  0xa9   :  { %v280_v43 = vadd.f32 %v442_v39, %v272_v41  ;;  %v260_v47 = vadd.f32 %v259_v46, %v246_v44 }
  0xab   :  { %v282_v45 = vpack.c.bf16 %v280_v43, %v280_v43 }
  0xad   :  { %285 = vst.msk [vmem:[#allocation2] sm:$0xf] %vm284_vm0, %v282_v45 }
  0xae   :  { %v273_v49 = vpop.f32.mrf.mxu2 }
  0xaf   :  { %v274_v50 = vadd.f32 %v273_v49, %v260_v47 }
  0xb1   :  { %v281_v51 = vadd.f32 %v443_v48, %v274_v50 }
  0xb3   :  { %v283_v52 = vpack.c.bf16 %v281_v51, %v281_v51 }
  0xb5   :  { %286 = vst.msk [vmem:[#allocation2 + $0x4] sm:$0xf] %vm284_vm0, %v283_v52 }
  0xb6   :  { %299 = dma.vmem_to_hbm [thread:$0]  %s292_s2, 128, %s294_s3, [#allocation3], %s475_s28, %s475_s28, %s476_s29  }
  0xb7   :  { %472 = dma.done.wait [#allocation3], 128  }
  0xb8   :  { %473 = vsyncadd [#allocation3], 4294967168 }
  0xb9   :  { %304 = vsyncpa [#allocation3], 1 }

</bundles_post_ra>
